<compile_context>
chip_gen: v7x
topology: tpu7x:2x2x1
jax: 0.10.0
libtpu: 0.0.40
codegen_flags: <defaults>
</compile_context>

<pallas_src>
import jax
import jax.numpy as jnp
from jax.experimental import pallas as pl
from jax.experimental.pallas import tpu as pltpu


def _round_up(x, m):
    return ((x + m - 1) // m) * m


# Kernel-row ordering of the 10 latent params (original torch index -> kernel row):
#   row 0: beta_M(3)  row 1: beta_shear(9)  row 2: M_cr(4)   row 3: crit_shear(8)
#   row 4: alpha_1(0) row 5: alpha_2(1)     row 6: k_cr(2)   row 7: n(7)
#   row 8: lnA(5)     row 9: EaR(6)
_PARAM_PERM = (3, 9, 4, 8, 0, 1, 2, 7, 5, 6)
# Per-row head constants: q = A * tanh(pre * p) + C   (sigmoid(x) = 0.5*tanh(0.5x)+0.5)
_HEAD_PRE = (0.5, 0.5, 1.0, 1.0, 0.5, 0.5, 1.0, 0.5, 1.0, 1.0)
_HEAD_A   = (15.0, 15.0, 1.0, 1.0, 1.5, 3.0, 1.0, 0.5, 0.0, 0.0)
_HEAD_C   = (25.0, 15.0, 0.0, 0.0, 1.5, 3.0, 0.0, 0.5, 0.0, 0.0)


def _penn_kernel(fp_ref, aux_ref, w1f_ref, w1a_ref, w2_ref, b2_ref,
                 w3_ref, b3_ref, hc_ref, o_ref):
    # fp_ref : (bt, n_fp) f32  -- natural layout, batch on sublanes
    # aux_ref: (8, bt)    f32  -- rows [M, S, T, PDI, 1, 0, 0, 0], batch on lanes
    cdt = w1f_ref.dtype                       # matmul dtype (bf16 default, or f32)
    aux = aux_ref[...]

    # ---- MLP_PENN (Linear -> ReLU -> Linear -> ReLU -> Linear), batch on lanes.
    # Layer 1: contract fp on its last dim (rhs-transposed matmul, no HBM transpose),
    # plus the tiny aux matmul that carries the PDI column and the folded b1 bias.
    h1 = jax.lax.dot_general(
        w1f_ref[...], fp_ref[...].astype(cdt),
        dimension_numbers=(((1,), (1,)), ((), ())),
        preferred_element_type=jnp.float32)                                  # (l1, bt)
    h1 = h1 + jnp.dot(w1a_ref[...], aux.astype(cdt),
                      preferred_element_type=jnp.float32)
    h1 = jnp.maximum(h1, 0.0)

    h2 = jnp.dot(w2_ref[...], h1.astype(cdt),
                 preferred_element_type=jnp.float32) + b2_ref[...]           # (l2, bt)
    h2 = jnp.maximum(h2, 0.0)

    p = jnp.dot(w3_ref[...], h2.astype(cdt),
                preferred_element_type=jnp.float32) + b3_ref[...]            # (10, bt)

    # ---- parameter head: ONE dense tanh pass over (10, bt), per-row affine folded in.
    hc = hc_ref[...]                                                         # (10, 3)
    q = hc[:, 1:2] * jnp.tanh(p * hc[:, 0:1]) + hc[:, 2:3]                   # (10, bt)

    betas = q[0:2, :]                      # [beta_M ; beta_shear]
    cent = aux[0:2, :] - q[2:4, :]         # [M - M_cr ; S - S_cr]           (2, bt)
    z = betas * cent
    # stable softplus-shift:  log(1+exp(-z)) + z  ==  max(z,0) + log(1+exp(-|z|))
    sp = jnp.maximum(z, 0.0) + jnp.log(1.0 + jnp.exp(-jnp.abs(z)))           # (2, bt)
    w = sp / betas                         # exact divide (beta_shear can be near 0)

    # Arrhenius shift: lnA + EaR * T
    a_t = p[8:9, :] + p[9:10, :] * aux[2:3, :]

    alpha_1 = q[4:5, :]
    eta_0 = (alpha_1 * cent[0:1, :] + (q[6:7, :] + a_t)
             + (q[5:6, :] - alpha_1) * w[0:1, :])
    eta = eta_0 - q[7:8, :] * w[1:2, :]                                      # (1, bt)
    o_ref[...] = eta.astype(o_ref.dtype)


def visc_penn_arrhenius_sp(fp, M, S, T, PDI, weights, *, block_b=8192,
                           matmul_dtype=jnp.bfloat16):
    """Forward pass.  fp: (B, n_fp); M/S/T/PDI: (B, 1) or (B,).  Returns eta: (B, 1).

    weights = (w1, b1, w2, b2, w3, b3) in PyTorch Linear layout: W (out, in), b (out,).
    The last column of w1 corresponds to PDI (torch.cat((fp, PDI), 1)).
    """
    w1, b1, w2, b2, w3, b3 = weights
    B, n_fp = fp.shape
    l1, l2, n_params = w1.shape[0], w2.shape[0], w3.shape[0]
    assert w1.shape[1] == n_fp + 1 and n_params == 10
    assert block_b >= 128 and block_b % 128 == 0
    f32 = jnp.float32

    fp = fp.astype(f32)
    row = lambda a: jnp.reshape(a, (1, B)).astype(f32)          # (B,1)->(1,B): reshape only
    aux = jnp.concatenate(
        [row(M), row(S), row(T), row(PDI),
         jnp.ones((1, B), f32), jnp.zeros((3, B), f32)], axis=0)             # (8, B)

    # layer-1 weights split: fp part + aux part (PDI column and b1 via the ones row)
    w1f = w1[:, :n_fp].astype(matmul_dtype)                                   # (l1, n_fp)
    w1a = jnp.concatenate(
        [jnp.zeros((l1, 3), f32),                  # M, S, T pass-through rows
         w1[:, n_fp:n_fp + 1].astype(f32),         # PDI column
         jnp.reshape(b1, (l1, 1)).astype(f32),     # b1 folded via ones row
         jnp.zeros((l1, 3), f32)], axis=1).astype(matmul_dtype)               # (l1, 8)
    w2k = w2.astype(matmul_dtype)
    b2k = jnp.reshape(b2, (l2, 1)).astype(f32)
    perm = jnp.array(_PARAM_PERM, dtype=jnp.int32)
    w3k = w3[perm, :].astype(matmul_dtype)                                    # (10, l2)
    b3k = jnp.reshape(b3[perm], (n_params, 1)).astype(f32)
    hc = jnp.stack([jnp.array(_HEAD_PRE, f32), jnp.array(_HEAD_A, f32),
                    jnp.array(_HEAD_C, f32)], axis=1)                         # (10, 3)

    # batch tile: lane-aligned, capped by block_b, and >=2 grid steps whenever possible
    # so both v7x TensorCores get work under dimension_semantics=("parallel",).
    if B <= 128:
        bt = B
    else:
        bt = min(block_b, _round_up(pl.cdiv(B, 2), 128))
    grid = (pl.cdiv(B, bt),)
    const = lambda i: (0, 0)   # weights / biases / head constants resident across steps

    out = pl.pallas_call(
        _penn_kernel,
        out_shape=jax.ShapeDtypeStruct((1, B), f32),
        grid=grid,
        in_specs=[
            pl.BlockSpec((bt, n_fp), lambda i: (i, 0)),     # fp  (natural layout)
            pl.BlockSpec((8, bt), lambda i: (0, i)),        # aux (batch on lanes)
            pl.BlockSpec((l1, n_fp), const),                # w1f
            pl.BlockSpec((l1, 8), const),                   # w1a (PDI col + b1)
            pl.BlockSpec((l2, l1), const),                  # w2
            pl.BlockSpec((l2, 1), const),                   # b2
            pl.BlockSpec((n_params, l2), const),            # w3 (row-permuted)
            pl.BlockSpec((n_params, 1), const),             # b3 (row-permuted)
            pl.BlockSpec((n_params, 3), const),             # head constants [pre|A|C]
        ],
        out_specs=pl.BlockSpec((1, bt), lambda i: (0, i)),
        compiler_params=pltpu.CompilerParams(
            dimension_semantics=("parallel",),
            vmem_limit_bytes=32 * 1024 * 1024),
    )(fp, aux, w1f, w1a, w2k, b2k, w3k, b3k, hc)

    return out.reshape(B, 1)     # torch: unsqueeze(eta, -1)


def _reference(fp, M, S, T, PDI, weights):
    """Pure-JAX f32 reference mirroring the PyTorch forward (eval mode)."""
    w1, b1, w2, b2, w3, b3 = weights
    hp = jax.lax.Precision.HIGHEST
    x = jnp.concatenate([fp, jnp.reshape(PDI, (-1, 1))], axis=1)
    h1 = jax.nn.relu(jnp.dot(x, w1.T, precision=hp) + b1)
    h2 = jax.nn.relu(jnp.dot(h1, w2.T, precision=hp) + b2)
    p = jnp.dot(h2, w3.T, precision=hp) + b3
    sig, tanh = jax.nn.sigmoid, jnp.tanh
    a1, a2 = sig(p[:, 0]) * 3.0, sig(p[:, 1]) * 6.0
    kcr, bM, Mcr = tanh(p[:, 2]), 10.0 + sig(p[:, 3]) * 30.0, tanh(p[:, 4])
    lnA, EaR = p[:, 5], p[:, 6]
    n, Scr, bS = sig(p[:, 7]), tanh(p[:, 8]), sig(p[:, 9]) * 30.0
    Mv, Sv, Tv = (jnp.reshape(a, (-1,)) for a in (M, S, T))
    sp = lambda z: jnp.maximum(z, 0.0) + jnp.log1p(jnp.exp(-jnp.abs(z)))
    a_t = lnA + EaR * Tv
    Mc = Mv - Mcr
    eta0 = a1 * Mc + (kcr + a_t) + (a2 - a1) / bM * sp(bM * Mc)
    eta = eta0 - n / bS * sp(bS * (Sv - Scr))
    return eta.reshape(-1, 1)


if __name__ == "__main__":
    n_fp, l1, l2, n_params = 16, 120, 120, 10

    key = jax.random.PRNGKey(0)
    ks = jax.random.split(key, 6)

    def init_linear(k, fan_in, fan_out):
        kw, kb = jax.random.split(k)
        bound = 1.0 / jnp.sqrt(float(fan_in))
        w = jax.random.uniform(kw, (fan_out, fan_in), jnp.float32, -bound, bound)
        b = jax.random.uniform(kb, (fan_out,), jnp.float32, -bound, bound)
        return w, b

    w1, b1 = init_linear(ks[0], n_fp + 1, l1)
    w2, b2 = init_linear(ks[1], l1, l2)
    w3, b3 = init_linear(ks[2], l2, n_params)
    weights = (w1, b1, w2, b2, w3, b3)

    def make_inputs(B, k0):
        kk = jax.random.split(k0, 5)
        return (jax.random.normal(kk[0], (B, n_fp), jnp.float32),
                jax.random.normal(kk[1], (B, 1), jnp.float32),
                jax.random.normal(kk[2], (B, 1), jnp.float32),
                jax.random.normal(kk[3], (B, 1), jnp.float32),
                jax.random.normal(kk[4], (B, 1), jnp.float32))

    # --- small single-block run ----------------------------------------------
    B = 8
    fp, M, S, T, PDI = make_inputs(B, ks[3])
    ref = _reference(fp, M, S, T, PDI, weights)

    eta_bf16 = jax.block_until_ready(visc_penn_arrhenius_sp(fp, M, S, T, PDI, weights))
    assert eta_bf16.shape == (B, 1)
    assert jnp.allclose(eta_bf16, ref, atol=1e-1, rtol=1e-1)      # bf16 matmul budget

    eta_f32 = jax.block_until_ready(
        visc_penn_arrhenius_sp(fp, M, S, T, PDI, weights, matmul_dtype=jnp.float32))
    assert jnp.allclose(eta_f32, ref, atol=2e-2, rtol=2e-2)

    # --- gridded run: B=384 -> bt=256, grid=(2,), partial last block ----------
    Bg = 384
    fpg, Mg, Sg, Tg, PDIg = make_inputs(Bg, ks[4])
    refg = _reference(fpg, Mg, Sg, Tg, PDIg, weights)

    etag = jax.block_until_ready(visc_penn_arrhenius_sp(fpg, Mg, Sg, Tg, PDIg, weights))
    assert etag.shape == (Bg, 1)
    assert bool(jnp.all(jnp.isfinite(etag)))
    assert jnp.allclose(etag, refg, atol=1e-1, rtol=1e-1)

    etag32 = jax.block_until_ready(
        visc_penn_arrhenius_sp(fpg, Mg, Sg, Tg, PDIg, weights, matmul_dtype=jnp.float32))
    assert jnp.allclose(etag32, refg, atol=2e-2, rtol=2e-2)

    # TODO(synk): training path (active Dropout, (eta, a1, a2) return) and the torch-side
    # debug prints / NaN dumps are intentionally not implemented (inference only).
    print("KERNEL_OK")
</pallas_src>

<mosaic_0001>
module attributes {stable_mosaic.version = 11 : i64} {
  func.func @_penn_kernel(%arg0: i32, %arg1: memref<8x16xf32, #tpu.memory_space<vmem>>, %arg2: memref<8x8xf32, #tpu.memory_space<vmem>>, %arg3: memref<120x16xbf16, #tpu.memory_space<vmem>>, %arg4: memref<120x8xbf16, #tpu.memory_space<vmem>>, %arg5: memref<120x120xbf16, #tpu.memory_space<vmem>>, %arg6: memref<120x1xf32, #tpu.memory_space<vmem>>, %arg7: memref<10x120xbf16, #tpu.memory_space<vmem>>, %arg8: memref<10x1xf32, #tpu.memory_space<vmem>>, %arg9: memref<10x3xf32, #tpu.memory_space<vmem>>, %arg10: memref<1x8xf32, #tpu.memory_space<vmem>>) attributes {dimension_semantics = [#tpu.dimension_semantics<parallel>], iteration_bounds = array<i64: 1>, scalar_prefetch = 0 : i64, scratch_operands = 0 : i64, tpu.core_type = #tpu.core_type<tc>, window_params = [{transform_indices = @transform_0, window_bounds = array<i64: 8, 16>}, {transform_indices = @transform_1, window_bounds = array<i64: 8, 8>}, {pipeline_mode = #tpu.pipeline_mode<synchronous>, transform_indices = @transform_2, window_bounds = array<i64: 120, 16>}, {pipeline_mode = #tpu.pipeline_mode<synchronous>, transform_indices = @transform_3, window_bounds = array<i64: 120, 8>}, {pipeline_mode = #tpu.pipeline_mode<synchronous>, transform_indices = @transform_4, window_bounds = array<i64: 120, 120>}, {pipeline_mode = #tpu.pipeline_mode<synchronous>, transform_indices = @transform_5, window_bounds = array<i64: 120, 1>}, {pipeline_mode = #tpu.pipeline_mode<synchronous>, transform_indices = @transform_6, window_bounds = array<i64: 10, 120>}, {pipeline_mode = #tpu.pipeline_mode<synchronous>, transform_indices = @transform_7, window_bounds = array<i64: 10, 1>}, {pipeline_mode = #tpu.pipeline_mode<synchronous>, transform_indices = @transform_8, window_bounds = array<i64: 10, 3>}, {transform_indices = @transform_9, window_bounds = array<i64: 1, 8>}]} {
    %c0 = arith.constant 0 : index
    %c0_0 = arith.constant 0 : index
    %0 = vector.load %arg2[%c0, %c0_0] : memref<8x8xf32, #tpu.memory_space<vmem>>, vector<8x8xf32>
    %c0_1 = arith.constant 0 : index
    %c0_2 = arith.constant 0 : index
    %1 = vector.load %arg3[%c0_1, %c0_2] : memref<120x16xbf16, #tpu.memory_space<vmem>>, vector<120x16xbf16>
    %c0_3 = arith.constant 0 : index
    %c0_4 = arith.constant 0 : index
    %2 = vector.load %arg1[%c0_3, %c0_4] : memref<8x16xf32, #tpu.memory_space<vmem>>, vector<8x16xf32>
    %3 = arith.truncf %2 : vector<8x16xf32> to vector<8x16xbf16>
    %cst = arith.constant dense<0.000000e+00> : vector<120x8xf32>
    %4 = tpu.matmul %1, %3, %cst {dimension_numbers = #tpu.dot_dimension_numbers<[1], [1], [0], [0], [0, 0, 1, 0], [], []>} : vector<120x16xbf16>, vector<8x16xbf16>, vector<120x8xf32> -> vector<120x8xf32>
    %c0_5 = arith.constant 0 : index
    %c0_6 = arith.constant 0 : index
    %5 = vector.load %arg4[%c0_5, %c0_6] : memref<120x8xbf16, #tpu.memory_space<vmem>>, vector<120x8xbf16>
    %6 = arith.truncf %0 : vector<8x8xf32> to vector<8x8xbf16>
    %cst_7 = arith.constant dense<0.000000e+00> : vector<120x8xf32>
    %7 = tpu.matmul %5, %6, %cst_7 {dimension_numbers = #tpu.dot_dimension_numbers<[1], [0], [0], [1], [0, 0, 1, 1], [], []>} : vector<120x8xbf16>, vector<8x8xbf16>, vector<120x8xf32> -> vector<120x8xf32>
    %8 = arith.addf %4, %7 : vector<120x8xf32>
    %cst_8 = arith.constant 0.000000e+00 : f32
    %9 = vector.broadcast %cst_8 : f32 to vector<120x8xf32>
    %10 = arith.maximumf %8, %9 : vector<120x8xf32>
    %c0_9 = arith.constant 0 : index
    %c0_10 = arith.constant 0 : index
    %11 = vector.load %arg5[%c0_9, %c0_10] : memref<120x120xbf16, #tpu.memory_space<vmem>>, vector<120x120xbf16>
    %12 = arith.truncf %10 : vector<120x8xf32> to vector<120x8xbf16>
    %cst_11 = arith.constant dense<0.000000e+00> : vector<120x8xf32>
    %13 = tpu.matmul %11, %12, %cst_11 {dimension_numbers = #tpu.dot_dimension_numbers<[1], [0], [0], [1], [0, 0, 1, 1], [], []>} : vector<120x120xbf16>, vector<120x8xbf16>, vector<120x8xf32> -> vector<120x8xf32>
    %c0_12 = arith.constant 0 : index
    %c0_13 = arith.constant 0 : index
    %14 = vector.load %arg6[%c0_12, %c0_13] : memref<120x1xf32, #tpu.memory_space<vmem>>, vector<120x1xf32>
    %15 = vector.broadcast %14 : vector<120x1xf32> to vector<120x8xf32>
    %16 = arith.addf %13, %15 : vector<120x8xf32>
    %cst_14 = arith.constant 0.000000e+00 : f32
    %17 = vector.broadcast %cst_14 : f32 to vector<120x8xf32>
    %18 = arith.maximumf %16, %17 : vector<120x8xf32>
    %c0_15 = arith.constant 0 : index
    %c0_16 = arith.constant 0 : index
    %19 = vector.load %arg7[%c0_15, %c0_16] : memref<10x120xbf16, #tpu.memory_space<vmem>>, vector<10x120xbf16>
    %20 = arith.truncf %18 : vector<120x8xf32> to vector<120x8xbf16>
    %cst_17 = arith.constant dense<0.000000e+00> : vector<10x8xf32>
    %21 = tpu.matmul %19, %20, %cst_17 {dimension_numbers = #tpu.dot_dimension_numbers<[1], [0], [0], [1], [0, 0, 1, 1], [], []>} : vector<10x120xbf16>, vector<120x8xbf16>, vector<10x8xf32> -> vector<10x8xf32>
    %c0_18 = arith.constant 0 : index
    %c0_19 = arith.constant 0 : index
    %22 = vector.load %arg8[%c0_18, %c0_19] : memref<10x1xf32, #tpu.memory_space<vmem>>, vector<10x1xf32>
    %23 = vector.broadcast %22 : vector<10x1xf32> to vector<10x8xf32>
    %24 = arith.addf %21, %23 : vector<10x8xf32>
    %c0_20 = arith.constant 0 : index
    %c0_21 = arith.constant 0 : index
    %25 = vector.load %arg9[%c0_20, %c0_21] : memref<10x3xf32, #tpu.memory_space<vmem>>, vector<10x3xf32>
    %26 = vector.extract_strided_slice %25 {offsets = [0, 1], sizes = [10, 1], strides = [1, 1]} : vector<10x3xf32> to vector<10x1xf32>
    %27 = vector.extract_strided_slice %25 {offsets = [0, 0], sizes = [10, 1], strides = [1, 1]} : vector<10x3xf32> to vector<10x1xf32>
    %28 = vector.broadcast %27 : vector<10x1xf32> to vector<10x8xf32>
    %29 = arith.mulf %24, %28 : vector<10x8xf32>
    %30 = math.tanh %29 : vector<10x8xf32>
    %31 = vector.broadcast %26 : vector<10x1xf32> to vector<10x8xf32>
    %32 = arith.mulf %31, %30 : vector<10x8xf32>
    %33 = vector.extract_strided_slice %25 {offsets = [0, 2], sizes = [10, 1], strides = [1, 1]} : vector<10x3xf32> to vector<10x1xf32>
    %34 = vector.broadcast %33 : vector<10x1xf32> to vector<10x8xf32>
    %35 = arith.addf %32, %34 : vector<10x8xf32>
    %36 = vector.extract_strided_slice %35 {offsets = [0, 0], sizes = [2, 8], strides = [1, 1]} : vector<10x8xf32> to vector<2x8xf32>
    %37 = vector.extract_strided_slice %0 {offsets = [0, 0], sizes = [2, 8], strides = [1, 1]} : vector<8x8xf32> to vector<2x8xf32>
    %38 = vector.extract_strided_slice %35 {offsets = [2, 0], sizes = [2, 8], strides = [1, 1]} : vector<10x8xf32> to vector<2x8xf32>
    %39 = arith.subf %37, %38 : vector<2x8xf32>
    %40 = arith.mulf %36, %39 : vector<2x8xf32>
    %cst_22 = arith.constant 0.000000e+00 : f32
    %41 = vector.broadcast %cst_22 : f32 to vector<2x8xf32>
    %42 = arith.maximumf %40, %41 : vector<2x8xf32>
    %43 = math.absf %40 : vector<2x8xf32>
    %cst_23 = arith.constant 0.000000e+00 : f32
    %44 = vector.broadcast %cst_23 : f32 to vector<2x8xf32>
    %45 = arith.subf %44, %43 : vector<2x8xf32>
    %46 = math.exp %45 : vector<2x8xf32>
    %cst_24 = arith.constant 1.000000e+00 : f32
    %47 = vector.broadcast %cst_24 : f32 to vector<2x8xf32>
    %48 = arith.addf %47, %46 : vector<2x8xf32>
    %49 = math.log %48 : vector<2x8xf32>
    %50 = arith.addf %42, %49 : vector<2x8xf32>
    %51 = arith.divf %50, %36 : vector<2x8xf32>
    %52 = vector.extract_strided_slice %24 {offsets = [8, 0], sizes = [1, 8], strides = [1, 1]} : vector<10x8xf32> to vector<1x8xf32>
    %53 = vector.extract_strided_slice %24 {offsets = [9, 0], sizes = [1, 8], strides = [1, 1]} : vector<10x8xf32> to vector<1x8xf32>
    %54 = vector.extract_strided_slice %0 {offsets = [2, 0], sizes = [1, 8], strides = [1, 1]} : vector<8x8xf32> to vector<1x8xf32>
    %55 = arith.mulf %53, %54 : vector<1x8xf32>
    %56 = arith.addf %52, %55 : vector<1x8xf32>
    %57 = vector.extract_strided_slice %35 {offsets = [4, 0], sizes = [1, 8], strides = [1, 1]} : vector<10x8xf32> to vector<1x8xf32>
    %58 = vector.extract_strided_slice %39 {offsets = [0, 0], sizes = [1, 8], strides = [1, 1]} : vector<2x8xf32> to vector<1x8xf32>
    %59 = arith.mulf %57, %58 : vector<1x8xf32>
    %60 = vector.extract_strided_slice %35 {offsets = [6, 0], sizes = [1, 8], strides = [1, 1]} : vector<10x8xf32> to vector<1x8xf32>
    %61 = arith.addf %60, %56 : vector<1x8xf32>
    %62 = arith.addf %59, %61 : vector<1x8xf32>
    %63 = vector.extract_strided_slice %35 {offsets = [5, 0], sizes = [1, 8], strides = [1, 1]} : vector<10x8xf32> to vector<1x8xf32>
    %64 = arith.subf %63, %57 : vector<1x8xf32>
    %65 = vector.extract_strided_slice %51 {offsets = [0, 0], sizes = [1, 8], strides = [1, 1]} : vector<2x8xf32> to vector<1x8xf32>
    %66 = arith.mulf %64, %65 : vector<1x8xf32>
    %67 = arith.addf %62, %66 : vector<1x8xf32>
    %68 = vector.extract_strided_slice %35 {offsets = [7, 0], sizes = [1, 8], strides = [1, 1]} : vector<10x8xf32> to vector<1x8xf32>
    %69 = vector.extract_strided_slice %51 {offsets = [1, 0], sizes = [1, 8], strides = [1, 1]} : vector<2x8xf32> to vector<1x8xf32>
    %70 = arith.mulf %68, %69 : vector<1x8xf32>
    %71 = arith.subf %67, %70 : vector<1x8xf32>
    %c0_25 = arith.constant 0 : index
    %c0_26 = arith.constant 0 : index
    %72 = vector.load %arg10[%c0_25, %c0_26] : memref<1x8xf32, #tpu.memory_space<vmem>>, vector<1x8xf32>
    tpu.vector_store %arg10[%c0_25, %c0_26], %71 {strides = array<i32>} : memref<1x8xf32, #tpu.memory_space<vmem>>, vector<1x8xf32>,
    return
  }
  func.func @transform_0(%arg0: i32) -> (i32, i32) {
    %c0_i32 = arith.constant 0 : i32
    %c0_i32_0 = arith.constant 0 : i32
    return %arg0, %c0_i32 : i32, i32
  }
  func.func @transform_1(%arg0: i32) -> (i32, i32) {
    %c0_i32 = arith.constant 0 : i32
    %c0_i32_0 = arith.constant 0 : i32
    return %c0_i32, %arg0 : i32, i32
  }
  func.func @transform_2(%arg0: i32) -> (i32, i32) {
    %c0_i32 = arith.constant 0 : i32
    %c0_i32_0 = arith.constant 0 : i32
    %c0_i32_1 = arith.constant 0 : i32
    return %c0_i32, %c0_i32_0 : i32, i32
  }
  func.func @transform_3(%arg0: i32) -> (i32, i32) {
    %c0_i32 = arith.constant 0 : i32
    %c0_i32_0 = arith.constant 0 : i32
    %c0_i32_1 = arith.constant 0 : i32
    return %c0_i32, %c0_i32_0 : i32, i32
  }
  func.func @transform_4(%arg0: i32) -> (i32, i32) {
    %c0_i32 = arith.constant 0 : i32
    %c0_i32_0 = arith.constant 0 : i32
    %c0_i32_1 = arith.constant 0 : i32
    return %c0_i32, %c0_i32_0 : i32, i32
  }
  func.func @transform_5(%arg0: i32) -> (i32, i32) {
    %c0_i32 = arith.constant 0 : i32
    %c0_i32_0 = arith.constant 0 : i32
    %c0_i32_1 = arith.constant 0 : i32
    return %c0_i32, %c0_i32_0 : i32, i32
  }
  func.func @transform_6(%arg0: i32) -> (i32, i32) {
    %c0_i32 = arith.constant 0 : i32
    %c0_i32_0 = arith.constant 0 : i32
    %c0_i32_1 = arith.constant 0 : i32
    return %c0_i32, %c0_i32_0 : i32, i32
  }
  func.func @transform_7(%arg0: i32) -> (i32, i32) {
    %c0_i32 = arith.constant 0 : i32
    %c0_i32_0 = arith.constant 0 : i32
    %c0_i32_1 = arith.constant 0 : i32
    return %c0_i32, %c0_i32_0 : i32, i32
  }
  func.func @transform_8(%arg0: i32) -> (i32, i32) {
    %c0_i32 = arith.constant 0 : i32
    %c0_i32_0 = arith.constant 0 : i32
    %c0_i32_1 = arith.constant 0 : i32
    return %c0_i32, %c0_i32_0 : i32, i32
  }
  func.func @transform_9(%arg0: i32) -> (i32, i32) {
    %c0_i32 = arith.constant 0 : i32
    %c0_i32_0 = arith.constant 0 : i32
    return %c0_i32, %arg0 : i32, i32
  }
}

</mosaic_0001>

<bundles_post_ra>
// kernel: tpu_custom_call.1
= control target key start
LH: loop header
LB: loop body
LE: loop exit
PB: predicated region body
PF: predicated region fallthrough
CT: control target
= control target key end

     0   :  { %vm131_vm0 = vcmask 1043456   ;;  %vm106_vm1 = vcmask 64512   ;;  %vm269_vm2 = vcmask 130048   ;;  %s1386_s0 = inlined_call_operand.vmem [shape: f32[8,16], index: 0, kind: input, shape index: {}]   ;;  %s1387_s1 = inlined_call_operand.vmem [shape: f32[8,8], index: 1, kind: input, shape index: {}]   ;;  %s1388_s2 = inlined_call_operand.vmem [shape: bf16[120,16], index: 2, kind: input, shape index: {}]   ;;  %s1389_s3 = inlined_call_operand.vmem [shape: bf16[120,8], index: 3, kind: input, shape index: {}]   ;;  %s1390_s4 = inlined_call_operand.vmem [shape: bf16[120,120], index: 4, kind: input, shape index: {}]   ;;  %s1391_s5 = inlined_call_operand.vmem [shape: f32[120,1], index: 5, kind: input, shape index: {}]   ;;  %s1392_s6 = inlined_call_operand.vmem [shape: bf16[10,120], index: 6, kind: input, shape index: {}]   ;;  %s1393_s7 = inlined_call_operand.vmem [shape: f32[10,1], index: 7, kind: input, shape index: {}]   ;;  %s1394_s8 = inlined_call_operand.vmem [shape: f32[10,3], index: 8, kind: input, shape index: {}]   ;;  %s1395_s9 = inlined_call_operand.hbm [shape: f32[1,8], index: 9, kind: output, shape index: {}]  }
   0x1   :  { %v1187_v0 = vld [vmem:[%s1387_s1] sm:$0xff]  ;;  %v1072_v5 = vld [vmem:[%s1389_s3 + $0x8] sm:$0xff]   ;;  %v1073_v7 = vld [vmem:[%s1389_s3 + $0x10] sm:$0xff]  }
   0x2   :  { %v67_v1 = vpack.c.bf16 %v1187_v0, %v1187_v0  ;;  %v1071_v2 = vld [vmem:[%s1389_s3] sm:$0xff]   ;;  %v1074_v9 = vld [vmem:[%s1389_s3 + $0x18] sm:$0xff]   ;;  %v1076_v11 = vld [vmem:[%s1389_s3 + $0x28] sm:$0xff]  }
   0x3   :  { %v50_v3 = vld [vmem:[%s1386_s0] sm:$0xff]  ;;  %955 = vmatprep.mubr.msk.bf16.mxu0 %vm106_vm1, %v1071_v2  ;;  %v1077_v12 = vld [vmem:[%s1389_s3 + $0x30] sm:$0xff]  }
   0x4   :  { %1057 = vmatprep.subr.msk.bf16.mxu0 %vm131_vm0, %v67_v1  ;;  %v133_v4 = vsel %vm131_vm0, %v67_v1, 0  ;;  %v51_v6 = vpack.c.bf16 %v50_v3, %v50_v3  ;;  %v1075_v10 = vld [vmem:[%s1389_s3 + $0x20] sm:$0xff]  }
   0x5   :  { %954 = vmatpush3.bf16.msra.mxu0 %v133_v4 }
   0x6   :  { %1058 = vmatprep.subr.msk.bf16.mxu0 %vm269_vm2, %v51_v6  ;;  %v295_v8 = vsel %vm269_vm2, %v51_v6, 0 }
   0x8   :  { %956 = vmatmul.mubr.msk.bf16.vlgmr.msra.gmra.mrb[0].mxu0 %vm106_vm1, %v1072_v5 }
   0x9   :  { %959 = vmatprep.mubr.msk.bf16.mxu0 %vm106_vm1, %v1073_v7 }
   0xe   :  { %972 = vmatpush3.bf16.xpose.msra.mxu0 %v295_v8 }
  0x10   :  { %960 = vmatmul.mubr.msk.bf16.gmra.mrb[4].mxu0 %vm106_vm1, %v1074_v9 }
  0x11   :  { %963 = vmatprep.mubr.msk.bf16.mxu0 %vm106_vm1, %v1075_v10 }
  0x12   :  { %14 = vsyncpa [#allocation3], 0  ;;  %v1078_v13 = vld [vmem:[%s1389_s3 + $0x38] ss:$0 sps:$4 sm:$0xff]   ;;  %v1079_v14 = vld [vmem:[%s1388_s2] sm:$0xff]   ;;  %vm559_vm3 = vcmask 982016  }
  0x13   :  { %v1080_v15 = vld [vmem:[%s1388_s2 + $0x8] sm:$0xff]   ;;  %v1081_v16 = vld [vmem:[%s1388_s2 + $0x10] sm:$0xff]   ;;  %v1082_v17 = vld [vmem:[%s1388_s2 + $0x18] sm:$0xff]   ;;  %v1128_v25 = vmov 0   ;;  %vm1130_vm4 = vmmov 0   ;;  %vm844_vm5 = vcmask 61444  }
  0x14   :  { %v1083_v18 = vld [vmem:[%s1388_s2 + $0x20] sm:$0xff]   ;;  %v1084_v19 = vld [vmem:[%s1388_s2 + $0x28] sm:$0xff]   ;;  %v1085_v20 = vld [vmem:[%s1388_s2 + $0x30] sm:$0xff]   ;;  %1066 = vset.pattern.permute.xlu0 %v1128_v25  ;;  %1067 = vset.pattern.permute.xlu1 %v1128_v25 }
  0x15   :  { %v1086_v21 = vld [vmem:[%s1388_s2 + $0x38] ss:$0 sps:$4 sm:$0xff]   ;;  %v1087_v22 = vld [vmem:[%s1390_s4] sm:$0xff]   ;;  %v433_v24 = vld [vmem:[%s1391_s5 + $0x10] sm:$0xff] }
  0x16   :  { %1005 = vmatprep.mubr.msk.bf16.mxu1 %vm559_vm3, %v1087_v22  ;;  %v431_v23 = vld [vmem:[%s1391_s5] sm:$0xff]  ;;  %458 = vperm.xlu1 %1067, %v433_v24   ;;  %v432_v26 = vld [vmem:[%s1391_s5 + $0x8] sm:$0xff]  ;;  %v434_v27 = vld [vmem:[%s1391_s5 + $0x18] sm:$0xff] }
  0x17   :  { %448 = vperm.xlu0 %1066, %v431_v23   ;;  %v435_v28 = vld [vmem:[%s1391_s5 + $0x20] sm:$0xff]  ;;  %v436_v29 = vld [vmem:[%s1391_s5 + $0x28] sm:$0xff]  ;;  %v437_v30 = vld [vmem:[%s1391_s5 + $0x30] sm:$0xff] }
  0x18   :  { %964 = vmatmul.mubr.msk.bf16.gmra.mrb[8].mxu0 %vm106_vm1, %v1076_v11  ;;  %v438_v31 = vld [vmem:[%s1391_s5 + $0x38] sm:$0xff]  ;;  %v439_v32 = vld [vmem:[%s1391_s5 + $0x40] sm:$0xff]  ;;  %v440_v33 = vld [vmem:[%s1391_s5 + $0x48] sm:$0xff] }
  0x19   :  { %967 = vmatprep.mubr.msk.bf16.mxu0 %vm106_vm1, %v1077_v12  ;;  %v441_v34 = vld [vmem:[%s1391_s5 + $0x50] sm:$0xff]  ;;  %v442_v35 = vld [vmem:[%s1391_s5 + $0x58] sm:$0xff]  ;;  %v443_v36 = vld [vmem:[%s1391_s5 + $0x60] sm:$0xff] }
  0x1a   :  { %463 = vperm.xlu1 %1067, %v434_v27   ;;  %v444_v37 = vld [vmem:[%s1391_s5 + $0x68] sm:$0xff]  ;;  %v445_v38 = vld [vmem:[%s1391_s5 + $0x70] sm:$0xff]  ;;  %v708_v39 = vld [vmem:[%s1393_s7] sm:$0xff]  ;;  %v1131_v27 = vmov 1  }
  0x1b   :  { %453 = vperm.xlu0 %1066, %v432_v26   ;;  %v1319_v40 = vld [vmem:[%s1394_s8] sm:$0xff]  ;;  %v1092_v22 = vld [vmem:[%s1390_s4 + $0x28] sm:$0xff]   ;;  %v1093_v23 = vld [vmem:[%s1390_s4 + $0x30] sm:$0xff]   ;;  %v1129_v26 = vmov 0.0  }
  0x1c   :  { %v1094_v24 = vld [vmem:[%s1390_s4 + $0x38] ss:$0 sps:$4 sm:$0xff]  }
  0x1e   :  { %473 = vperm.xlu1 %1067, %v436_v29   ;;  %v709_v29 = vld [vmem:[%s1393_s7 + $0x8] sm:$0x3] }
  0x1f   :  { %468 = vperm.xlu0 %1066, %v435_v28   ;;  %v1132_v28 = vmov 2  }
  0x20   :  { %968 = vmatmul.mubr.msk.bf16.gmra.mrb[12].mxu0 %vm106_vm1, %v1078_v13 }
  0x21   :  { %973 = vmatprep.mubr.msk.bf16.mxu0 %vm269_vm2, %v1079_v14 }
  0x22   :  { %483 = vperm.xlu1 %1067, %v438_v31  }
  0x23   :  { %478 = vperm.xlu0 %1066, %v437_v30  }
  0x26   :  { %493 = vperm.xlu1 %1067, %v440_v33  }
  0x27   :  { %488 = vperm.xlu0 %1066, %v439_v32  }
  0x28   :  { %974 = vmatmul.mubr.msk.bf16.vlgmr.msra.gmra.mrb[0].mxu0 %vm269_vm2, %v1080_v15 }
  0x29   :  { %977 = vmatprep.mubr.msk.bf16.mxu0 %vm269_vm2, %v1081_v16 }
  0x2a   :  { %503 = vperm.xlu1 %1067, %v442_v35  }
  0x2b   :  { %498 = vperm.xlu0 %1066, %v441_v34  }
  0x2e   :  { %513 = vperm.xlu1 %1067, %v444_v37  }
  0x2f   :  { %508 = vperm.xlu0 %1066, %v443_v36  }
  0x30   :  { %978 = vmatmul.mubr.msk.bf16.gmra.mrb[4].mxu0 %vm269_vm2, %v1082_v17 }
  0x31   :  { %981 = vmatprep.mubr.msk.bf16.mxu0 %vm269_vm2, %v1083_v18  ;;  %v1088_v18 = vld [vmem:[%s1390_s4 + $0x8] sm:$0xff]  }
  0x32   :  { %712 = vperm.xlu1 %1067, %v708_v39  }
  0x33   :  { %518 = vperm.xlu0 %1066, %v445_v38  }
  0x36   :  { %1068 = vset.pattern.permute.xlu1 %v1131_v27 }
  0x37   :  { %775 = vperm.xlu0 %1066, %v1319_v40   ;;  %781 = vperm.xlu1 %1068, %v1319_v40  }
  0x38   :  { %982 = vmatmul.mubr.msk.bf16.gmra.mrb[8].mxu0 %vm269_vm2, %v1084_v19  ;;  %v1089_v19 = vld [vmem:[%s1390_s4 + $0x10] sm:$0xff]  }
  0x39   :  { %985 = vmatprep.mubr.msk.bf16.mxu0 %vm269_vm2, %v1085_v20  ;;  %v1090_v20 = vld [vmem:[%s1390_s4 + $0x18] sm:$0xff]  }
  0x3b   :  { %1069 = vset.pattern.permute.xlu0 %v1132_v28  ;;  %1070 = vset.pattern.permute.xlu1 %v1128_v25 }
  0x3c   :  { %786 = vperm.xlu0 %1069, %v1319_v40   ;;  %717 = vperm.xlu1 %1070, %v709_v29  }
  0x40   :  { %986 = vmatmul.mubr.msk.bf16.gmra.mrb[12].mxu0 %vm269_vm2, %v1086_v21  ;;  %v1091_v21 = vld [vmem:[%s1390_s4 + $0x20] sm:$0xff]  }
  0x95   :  { %v459_v31 = vpop.permute.xlu1 %458 }
  0x96   :  { %v449_v30 = vpop.permute.xlu0 %448 }
  0x99   :  { %v464_v33 = vpop.permute.xlu1 %463 }
  0x9a   :  { %v454_v32 = vpop.permute.xlu0 %453 }
  0x9d   :  { %v474_v35 = vpop.permute.xlu1 %473 }
  0x9e   :  { %v469_v34 = vpop.permute.xlu0 %468 }
  0xa2   :  { %v479_v36 = vpop.permute.xlu0 %478 }
  0xa6   :  { %v489_v25 = vpop.permute.xlu0 %488 }
  0xfb   :  { %v975_v41 = vpop.f32.mrb[0].mxu0 }
  0xfc   :  { %v331_v42 = vpop.f32.mrb[1].mxu0  ;;  %v395_v44 = vmax.f32 %v975_v41, 0.0 }
  0xfd   :  { %v976_v43 = vpop.f32.mrb[2].mxu0  ;;  %v393_v47 = vmax.f32 %v331_v42, 0.0 }
  0xfe   :  { %v396_v45 = vmax.f32 %v976_v43, 0.0  ;;  %v334_v46 = vpop.f32.mrb[3].mxu0 }
  0xff   :  { %v394_v48 = vmax.f32 %v334_v46, 0.0 }
 0x100   :  { %v424_v49 = vpack.c.bf16 %v396_v45, %v395_v44  ;;  %v484_v45 = vpop.permute.xlu1 %483 }
 0x101   :  { %v423_v50 = vpack.c.bf16 %v394_v48, %v393_v47 }
 0x103   :  { %v979_v51 = vpop.f32.mrb[4].mxu0  ;;  %989 = vmatprep.subr.bf16.mxu1 %v423_v50 }
 0x104   :  { %v347_v52 = vpop.f32.mrb[5].mxu0  ;;  %990 = vmatpush3.bf16.msra.mxu1 %v423_v50  ;;  %v399_v54 = vmax.f32 %v979_v51, 0.0 }
 0x105   :  { %v980_v53 = vpop.f32.mrb[6].mxu0  ;;  %991 = vmatprep.subr.bf16.mxu1 %v424_v49  ;;  %v397_v57 = vmax.f32 %v347_v52, 0.0 }
 0x106   :  { %v400_v55 = vmax.f32 %v980_v53, 0.0  ;;  %v350_v56 = vpop.f32.mrb[7].mxu0 }
 0x107   :  { %v398_v58 = vmax.f32 %v350_v56, 0.0 }
 0x108   :  { %v426_v59 = vpack.c.bf16 %v400_v55, %v399_v54  ;;  %992 = vmatpush3.bf16.msra.mxu1 %v424_v49 }
 0x109   :  { %v425_v60 = vpack.c.bf16 %v398_v58, %v397_v57  ;;  %v494_v57 = vpop.permute.xlu1 %493 }
 0x10b   :  { %v983_v61 = vpop.f32.mrb[8].mxu0  ;;  %993 = vmatprep.subr.bf16.mxu1 %v425_v60 }
 0x10c   :  { %v363_v62 = vpop.f32.mrb[9].mxu0  ;;  %994 = vmatpush3.bf16.msra.mxu1 %v425_v60  ;;  %v403_v1 = vmax.f32 %v983_v61, 0.0  ;;  %v499_v60 = vpop.permute.xlu0 %498 }
 0x10d   :  { %v984_v63 = vpop.f32.mrb[10].mxu0  ;;  %995 = vmatprep.subr.bf16.mxu1 %v426_v59  ;;  %v401_v4 = vmax.f32 %v363_v62, 0.0 }
 0x10e   :  { %v404_v2 = vmax.f32 %v984_v63, 0.0  ;;  %v366_v3 = vpop.f32.mrb[11].mxu0 }
 0x10f   :  { %v402_v5 = vmax.f32 %v366_v3, 0.0 }
 0x110   :  { %v428_v6 = vpack.c.bf16 %v404_v2, %v403_v1  ;;  %996 = vmatpush3.bf16.msra.mxu1 %v426_v59 }
 0x111   :  { %v427_v7 = vpack.c.bf16 %v402_v5, %v401_v4 }
 0x113   :  { %v987_v8 = vpop.f32.mrb[12].mxu0  ;;  %997 = vmatprep.subr.bf16.mxu1 %v427_v7 }
 0x114   :  { %v379_v9 = vpop.f32.mrb[13].mxu0  ;;  %998 = vmatpush3.bf16.msra.mxu1 %v427_v7  ;;  %v407_v12 = vmax.f32 %v987_v8, 0.0 }
 0x115   :  { %v988_v10 = vpop.f32.mrb[14].mxu0  ;;  %999 = vmatprep.subr.bf16.mxu1 %v428_v6  ;;  %v405_v13 = vmax.f32 %v379_v9, 0.0  ;;  %v509_v9 = vpop.permute.xlu0 %508 }
 0x116   :  { %v382_v11 = vpop.f32.mrb[15].mxu0  ;;  %v430_v16 = vpack.c.bf16 %v407_v12, %v407_v12 }
 0x117   :  { %v406_v14 = vmax.f32 %v382_v11, 0.0 }
 0x118   :  { %1000 = vmatpush3.bf16.msra.mxu1 %v428_v6  ;;  %v585_v17 = vsel %vm131_vm0, %v430_v16, 0  ;;  %v504_v6 = vpop.permute.xlu1 %503 }
 0x119   :  { %v429_v15 = vpack.c.bf16 %v406_v14, %v405_v13 }
 0x11b   :  { %1001 = vmatprep.subr.bf16.mxu1 %v429_v15 }
 0x11c   :  { %1002 = vmatpush3.bf16.msra.mxu1 %v429_v15  ;;  %v514_v29 = vpop.permute.xlu1 %513 }
 0x11d   :  { %1059 = vmatprep.subr.msk.bf16.mxu1 %vm131_vm0, %v430_v16 }
 0x120   :  { %1004 = vmatpush3.bf16.msra.mxu1 %v585_v17 }
 0x121   :  { %1021 = vmatprep.subr.bf16.mxu1 %v1129_v26 }
 0x123   :  { %1006 = vmatmul.mubr.msk.bf16.vlgmr.msra.gmra.mrb[0].mxu1 %vm559_vm3, %v1088_v18 }
 0x124   :  { %1009 = vmatprep.mubr.msk.bf16.mxu1 %vm559_vm3, %v1089_v19 }
 0x12b   :  { %1010 = vmatmul.mubr.msk.bf16.gmra.mrb[4].mxu1 %vm559_vm3, %v1090_v20  ;;  %v519_v20 = vpop.permute.xlu0 %518 }
 0x12c   :  { %1013 = vmatprep.mubr.msk.bf16.mxu1 %vm559_vm3, %v1091_v21 }
 0x133   :  { %1014 = vmatmul.mubr.msk.bf16.gmra.mrb[8].mxu1 %vm559_vm3, %v1092_v22 }
 0x134   :  { %1017 = vmatprep.mubr.msk.bf16.mxu1 %vm559_vm3, %v1093_v23 }
 0x13b   :  { %1018 = vmatmul.mubr.msk.bf16.gmra.mrb[12].mxu1 %vm559_vm3, %v1094_v24 }
 0x13c   :  { %1037 = vmatprep.mubr.msk.bf16.mxu1 %vm1130_vm4, %v1129_v26 }
 0x1f6   :  { %v1007_v37 = vpop.f32.mrb[0].mxu1 }
 0x1f7   :  { %v630_v38 = vadd.f32 %v1007_v37, %v459_v31  ;;  %v621_v39 = vpop.f32.mrb[1].mxu1 }
 0x1f8   :  { %v622_v41 = vadd.f32 %v621_v39, %v449_v30  ;;  %v1008_v42 = vpop.f32.mrb[2].mxu1  ;;  %v713_v39 = vpop.permute.xlu1 %712 }
 0x1f9   :  { %v633_v40 = vadd.f32 %v1008_v42, %v464_v33  ;;  %v624_v43 = vpop.f32.mrb[3].mxu1  ;;  %v685_v46 = vmax.f32 %v630_v38, 0.0  ;;  %v1095_v38 = vld [vmem:[%s1392_s6] sm:$0x1f]   ;;  %s1133_s6 = smov [#allocation2]  }
 0x1fa   :  { %v625_v44 = vadd.f32 %v624_v43, %v454_v32  ;;  %v683_v48 = vmax.f32 %v622_v41, 0.0  ;;  %s852_s19 = sshll.u32 %s1133_s6, 4  ;;  %s853_s19 = int_to_ptr.vmem [resolvable:$true] %s852_s19 }
 0x1fb   :  { %v686_v47 = vmax.f32 %v633_v40, 0.0  ;;  %s1104_s20 = scalar_lea.vmem %s853_s19, 16  ;;  %s1108_s21 = scalar_lea.vmem %s853_s19, 32 }
 0x1fc   :  { %v684_v49 = vmax.f32 %v625_v44, 0.0  ;;  %v782_v41 = vpop.permute.xlu1 %781  ;;  %p1105_p0 = scmp.ne.s32.totalorder %s853_s19, %s1104_s20  ;;  %p1109_p1 = scmp.lt.s32.totalorder %s853_s19, %s853_s19 }
 0x1fd   :  { %v701_v50 = vpack.c.bf16 %v686_v47, %v685_v46  ;;  %v807_v47 = vrot.slane %v1187_v0, 1  ;;  %p1110_p2 = scmp.lt.s32.totalorder %s1108_s21, %s1104_s20 }
 0x1fe   :  { %v700_v51 = vpack.c.bf16 %v684_v49, %v683_v48  ;;  %v1011_v52 = vpop.f32.mrb[4].mxu1 }
 0x1ff   :  { %v646_v53 = vadd.f32 %v1011_v52, %v479_v36  ;;  %v637_v54 = vpop.f32.mrb[5].mxu1  ;;  %p1111_p3 = por %p1110_p2, %p1109_p1 }
 0x200   :  { %v638_v55 = vadd.f32 %v637_v54, %v469_v34  ;;  %v1012_v56 = vpop.f32.mrb[6].mxu1  ;;  %1022 = vmatpush3.bf16.msra.mxu1 %v700_v51  ;;  %v718_v40 = vpop.permute.xlu1 %717 }
 0x201   :  { %v649_v58 = vadd.f32 %v1012_v56, %v484_v45  ;;  %v640_v59 = vpop.f32.mrb[7].mxu1  ;;  %1023 = vmatprep.subr.bf16.mxu1 %v1129_v26  ;;  %v689_v62 = vmax.f32 %v646_v53, 0.0  ;;  %v776_v45 = vpop.permute.xlu0 %775  ;;  %p1112_p4 = pnand %p1111_p3, %p1105_p0 }
 0x202   :  { %v641_v61 = vadd.f32 %v640_v59, %v474_v35  ;;  %v687_v1 = vmax.f32 %v638_v55, 0.0 }
 0x203   :  { %v690_v63 = vmax.f32 %v649_v58, 0.0 }
 0x204   :  { %v688_v2 = vmax.f32 %v641_v61, 0.0  ;;  %1024 = vmatpush3.bf16.msra.mxu1 %v701_v50 }
 0x205   :  { %v703_v3 = vpack.c.bf16 %v690_v63, %v689_v62  ;;  %1025 = vmatprep.subr.bf16.mxu1 %v1129_v26  ;;  %v787_v53 = vpop.permute.xlu0 %786 }
 0x206   :  { %v702_v4 = vpack.c.bf16 %v688_v2, %v687_v1  ;;  %v1015_v5 = vpop.f32.mrb[8].mxu1 }
 0x207   :  { %v662_v7 = vadd.f32 %v1015_v5, %v499_v60  ;;  %v653_v8 = vpop.f32.mrb[9].mxu1 }
 0x208   :  { %v654_v10 = vadd.f32 %v653_v8, %v489_v25  ;;  %v1016_v11 = vpop.f32.mrb[10].mxu1  ;;  %1026 = vmatpush3.bf16.msra.mxu1 %v702_v4 }
 0x209   :  { %v665_v12 = vadd.f32 %v1016_v11, %v504_v6  ;;  %v656_v13 = vpop.f32.mrb[11].mxu1  ;;  %1027 = vmatprep.subr.bf16.mxu1 %v1129_v26  ;;  %v693_v15 = vmax.f32 %v662_v7, 0.0 }
 0x20a   :  { %v657_v14 = vadd.f32 %v656_v13, %v494_v57  ;;  %v691_v17 = vmax.f32 %v654_v10, 0.0 }
 0x20b   :  { %v694_v16 = vmax.f32 %v665_v12, 0.0 }
 0x20c   :  { %v692_v18 = vmax.f32 %v657_v14, 0.0  ;;  %1028 = vmatpush3.bf16.msra.mxu1 %v703_v3 }
 0x20d   :  { %v705_v19 = vpack.c.bf16 %v694_v16, %v693_v15  ;;  %1029 = vmatprep.subr.bf16.mxu1 %v1129_v26 }
 0x20e   :  { %v704_v21 = vpack.c.bf16 %v692_v18, %v691_v17  ;;  %v1019_v22 = vpop.f32.mrb[12].mxu1 }
 0x20f   :  { %v678_v23 = vadd.f32 %v1019_v22, %v519_v20  ;;  %v669_v24 = vpop.f32.mrb[13].mxu1 }
 0x210   :  { %v670_v27 = vadd.f32 %v669_v24, %v509_v9  ;;  %v1020_v28 = vpop.f32.mrb[14].mxu1  ;;  %1030 = vmatpush3.bf16.msra.mxu1 %v704_v21 }
 0x211   :  { %v672_v30 = vpop.f32.mrb[15].mxu1  ;;  %1031 = vmatprep.subr.bf16.mxu1 %v1129_v26  ;;  %v697_v32 = vmax.f32 %v678_v23, 0.0 }
 0x212   :  { %v673_v31 = vadd.f32 %v672_v30, %v514_v29  ;;  %v695_v33 = vmax.f32 %v670_v27, 0.0 }
 0x213   :  { %v707_v36 = vpack.c.bf16 %v697_v32, %v697_v32 }
 0x214   :  { %v696_v34 = vmax.f32 %v673_v31, 0.0  ;;  %1032 = vmatpush3.bf16.msra.mxu1 %v705_v19 }
 0x215   :  { %1033 = vmatprep.subr.bf16.mxu1 %v1129_v26  ;;  %v729_v37 = vsel %vm131_vm0, %v707_v36, 0 }
 0x216   :  { %v706_v35 = vpack.c.bf16 %v696_v34, %v695_v33 }
 0x218   :  { %1034 = vmatpush3.bf16.msra.mxu1 %v706_v35 }
 0x219   :  { %1035 = vmatprep.subr.bf16.mxu1 %v1129_v26 }
 0x21c   :  { %1036 = vmatpush3.bf16.msra.mxu1 %v729_v37 }
 0x21f   :  { %1038 = vmatmul.mubr.msk.bf16.vlgmr.msra.gmra.mrb[16].mxu1 %vm559_vm3, %v1095_v38 }
 0x2f2   :  { %v765_v42 = vpop.f32.mrb[16].mxu1 }
 0x2f3   :  { %v766_v43 = vadd.f32 %v765_v42, %v713_v39  ;;  %v1039_v44 = vpop.f32.mrb[17].mxu1 }
 0x2f4   :  { %v768_v46 = vpop.f32.mrb[18].mxu1 }
 0x2f5   :  { %v778_v26 = vmul.f32 %v776_v45, %v766_v43  ;;  %v769_v25 = vadd.f32 %v768_v46, %v718_v40  ;;  %v1040_v48 = vpop.f32.mrb[19].mxu1 }
 0x2f7   :  { %1096 = vtanh.f32 %v778_v26  ;;  %v809_v49 = vmul.f32 %v807_v47, %v769_v25 }
 0x2f9   :  { %v811_v50 = vrot.slane %v809_v49, 1 }
 0x2fb   :  { %v813_v51 = vadd.f32 %v811_v50, %v769_v25 }
 0x2fd   :  { %v819_v55 = vrot.slane %v813_v51, 2 }
 0x301   :  { %v1097_v52 = vpop.eup %1096 }
 0x302   :  { %v784_v54 = vmul.f32 %v1097_v52, %v782_v41 }
 0x304   :  { %v789_v56 = vadd.f32 %v787_v53, %v784_v54 }
 0x306   :  { %v791_v57 = vrot.slane %v789_v56, 2  ;;  %v821_v58 = vadd.f32 %v819_v55, %v789_v56  ;;  %v826_v11 = vrot.slane %v789_v56, 7 }
 0x308   :  { %v793_v59 = vsub.f32 %v1187_v0, %v791_v57  ;;  %v823_v1 = vrot.slane %v821_v58, 2  ;;  %v828_v13 = vsub.f32 %v789_v56, %v826_v11 }
 0x30a   :  { %v794_v60 = vmul.f32 %v793_v59, %v789_v56  ;;  %v815_v61 = vrot.slane %v793_v59, 4 }
 0x30c   :  { %v796_v62 = vand.u32 2147483647, %v794_v60  ;;  %v817_v63 = vmul.f32 %v815_v61, %v789_v56  ;;  %v795_v8 = vmax.f32 %v794_v60, 0.0 }
 0x30e   :  { %v797_v2 = vsub.f32 0.0, %v796_v62  ;;  %v825_v3 = vadd.f32 %v823_v1, %v817_v63 }
 0x310   :  { %v798_v4 = vmul.f32 1.442695, %v797_v2 }
 0x312   :  { %1098 = vpow2.f32 %v798_v4 }
 0x31c   :  { %v1099_v5 = vpop.eup %1098 }
 0x31d   :  { %v800_v6 = vadd.f32 1.0, %v1099_v5 }
 0x31f   :  { %1100 = vlog2.f32 %v800_v6 }
 0x320   :  { %1102 = vrcp.f32 %v789_v56 }
 0x329   :  { %v1101_v7 = vpop.eup %1100 }
 0x32a   :  { %v802_v9 = vmul.f32 0.6931472, %v1101_v7  ;;  %v1103_v12 = vpop.eup %1102 }
 0x32c   :  { %v803_v10 = vadd.f32 %v802_v9, %v795_v8 }
 0x32e   :  { %v805_v0 = vmul.f32 %v1103_v12, %v803_v10 }
 0x330   :  { %v830_v14 = vrot.slane %v805_v0, 3  ;;  %v837_v15 = vrot.slane %v805_v0, 2 }
 0x332   :  { %v832_v16 = vmul.f32 %v830_v14, %v828_v13  ;;  %v839_v17 = vmul.f32 %v837_v15, %v789_v56 }
 0x334   :  { %v834_v18 = vrot.slane %v832_v16, 1  ;;  %v841_v20 = vrot.slane %v839_v17, 3 }
 0x336   :  { %v836_v19 = vadd.f32 %v834_v18, %v825_v3 }
 0x338   :  { %v843_v21 = vsub.f32 %v836_v19, %v841_v20 }
 0x33a   :  { %845 = vst.msk [vmem:[#allocation2 - $0x4] sm:$0x10] %vm844_vm5, %v843_v21 }
 0x33b   :  { %1115 = shalt.err (!%p1112_p4)
}
 0x33c   :  { %s1116_s24 = scalar_lea.hbm %s1395_s9, 16 }
 0x33d   :  { %p1117_p5 = scmp.ne.s32.totalorder %s1395_s9, %s1116_s24  ;;  %p1120_p6 = scmp.lt.u32.totalorder %s1116_s24, %s1395_s9 }
 0x33f   :  { %p1122_p7 = pnand %p1120_p6, %p1117_p5 }
 0x341   :  { %1125 = shalt.err (!%p1122_p7)
}
 0x342   :  { %855 = dma.vmem_to_hbm [thread:$0]  %s853_s19, 16, %s1395_s9, [#allocation3]  }
 0x343   :  { %1126 = dma.done.wait [#allocation3], 16  }
 0x344   :  { %1127 = vsyncadd [#allocation3], 4294967280 }
 0x345   :  { %859 = vsyncpa [#allocation3], 1 }

</bundles_post_ra>
